<compile_context>
chip_gen: v5e
topology: v5e:2x2
jax: 0.10.0
libtpu: 0.0.40
codegen_flags: <defaults>
</compile_context>

<pallas_src>
import jax
import jax.numpy as jnp
from jax.experimental import pallas as pl
from jax.experimental.pallas import tpu as pltpu

_LANE = 128


def _round_up(n, m):
    return ((n + m - 1) // m) * m


def _generator_kernel(noise_ref, cond_ref, wz_ref, wc_ref, w2_ref, b1_ref, b2_ref, out_ref):
    wdt = wz_ref.dtype
    # linear1 with TLN + condition-normalization pre-folded; two dots replace the
    # wrapper-side [noise | tln(cond)] concat (same MXU work, no extra HBM traffic).
    h1 = (jnp.dot(noise_ref[...].astype(wdt), wz_ref[...], preferred_element_type=jnp.float32)
          + jnp.dot(cond_ref[...].astype(wdt), wc_ref[...], preferred_element_type=jnp.float32)
          + b1_ref[...])
    h1 = jnp.maximum(h1, 0.0)
    # linear2 with output denormalization pre-folded.  Output keeps its true width P
    # (masked store when P < 128, but far less HBM writeback than a lane-padded output).
    out_ref[...] = (jnp.dot(h1.astype(w2_ref.dtype), w2_ref[...],
                            preferred_element_type=jnp.float32)
                    + b2_ref[...]).astype(out_ref.dtype)


def prepare_kernel_params(params, mean, std, noise_dim, dtype=jnp.float32):
    """Fold TLN + normalization + denormalization into lane-padded matmul operands.

    Run ONCE per parameter set.  `dtype` may be jnp.bfloat16 on v6e/v7x (weights/activations
    in bf16, f32 accumulation & biases); default float32 matches the torch module exactly.
    NOTE: folds assume scalar mean/std (as in the reference module).
    """
    mean = jnp.float32(mean)
    std = jnp.float32(std)

    w_tln = params["w_tln"].astype(jnp.float32)     # (H, L)
    b_tln = params["b_tln"].astype(jnp.float32)     # (H,)
    w1 = params["w1"].astype(jnp.float32)           # (D, D), D = H + Z
    b1 = params["b1"].astype(jnp.float32)           # (D,)
    w2 = params["w2"].astype(jnp.float32)           # (P, D)
    b2 = params["b2"].astype(jnp.float32)           # (P,)

    H, L = w_tln.shape
    D = w1.shape[0]
    Z = int(noise_dim)
    P = w2.shape[0]
    assert D == H + Z

    wt_T = w_tln.T                                  # (L, H)
    w1a = w1[:, :Z].T                               # (Z, D)  noise slice of linear1
    w1b = w1[:, Z:].T                               # (H, D)  tln   slice of linear1

    # Fold TLN + normalization:
    #   t @ w1b == cond @ Wc + bc,  Wc = (wt_T @ w1b)/std,
    #   bc = (b_tln - (mean/std) * colsum(wt_T)) @ w1b
    wc = (wt_T @ w1b) / std                                             # (L, D)
    bc = (b_tln.reshape(1, H)
          - (mean / std) * jnp.sum(wt_T, axis=0, keepdims=True)) @ w1b  # (1, D)
    b1_fold = b1.reshape(1, D) + bc                                     # (1, D)

    # Fold denormalization into linear2.
    w2_s = w2.T * std                                                   # (D, P)
    b2_s = b2.reshape(1, P) * std + mean                                # (1, P)

    # Pad ONLY the hidden feature dim to a full lane width; output dim stays at P.
    D_pad = _round_up(max(D, _LANE), _LANE)

    w_noise = jnp.zeros((Z, D_pad), jnp.float32).at[:, :D].set(w1a)
    w_cond = jnp.zeros((L, D_pad), jnp.float32).at[:, :D].set(wc)
    w2_p = jnp.zeros((D_pad, P), jnp.float32).at[:D, :].set(w2_s)
    b1_p = jnp.zeros((1, D_pad), jnp.float32).at[:, :D].set(b1_fold)

    return {
        "w_noise": w_noise.astype(dtype),   # (Z, D_pad)
        "w_cond": w_cond.astype(dtype),     # (L, D_pad)
        "w2": w2_p.astype(dtype),           # (D_pad, P)
        "b1": b1_p,                         # (1, D_pad) f32
        "b2": b2_s,                         # (1, P)     f32
        "dims": (Z, L, D, P, D_pad),
    }


def generator_with_tln_forward(noise, condition, h_0, c_0, kparams, *, block_rows=2048):
    """noise: (1,B,Z), condition: (1,B,L), h_0/c_0: (1,B,H) (unused on the TLN path)."""
    del h_0, c_0  # TLN replaces the LSTM; state is unused
    Z, L, D, P, D_pad = kparams["dims"]
    _, B, _ = noise.shape

    # Batch tile: large (amortizes ~0.35us/step grid overhead), sublane-aligned, but kept
    # small enough that the grid has >= 2 steps when B allows (v7x dual-TC sharding).
    TB = min(_round_up(block_rows, 8), _round_up(B, 8))
    if B > 8 and pl.cdiv(B, TB) < 2:
        TB = _round_up(pl.cdiv(B, 2), 8)
    grid = (pl.cdiv(B, TB),)   # batch tail handled by Pallas OOB block clipping (no jnp.pad)

    # Rough double-buffered VMEM estimate; raise the scoped limit only when the defaults
    # (16 MiB on v5e, 32 MiB on v6e/v7x) would not fit.
    in_item = jnp.dtype(noise.dtype).itemsize
    w_item = jnp.dtype(kparams["w_noise"].dtype).itemsize
    est = 2 * (TB * (Z + L) * in_item            # activation blocks
               + TB * P * 4                      # output blocks
               + (Z + L) * D_pad * w_item        # linear1 weights (double-buffered by Pallas)
               + D_pad * P * w_item              # linear2 weights
               + (D_pad + P) * 4                 # biases
               + TB * D_pad * 4)                 # h1 intermediate headroom
    cp = {"dimension_semantics": ("parallel",)}
    if est > 16 * (1 << 20):
        cp["vmem_limit_bytes"] = int(min(max(2 * est, 32 * (1 << 20)), 64 * (1 << 20)))

    out = pl.pallas_call(
        _generator_kernel,
        out_shape=jax.ShapeDtypeStruct((B, P), jnp.float32),
        grid=grid,
        in_specs=[
            pl.BlockSpec((None, TB, Z), lambda i: (0, i, 0)),   # noise: streamed per tile
            pl.BlockSpec((None, TB, L), lambda i: (0, i, 0)),   # condition: streamed per tile
            pl.BlockSpec((Z, D_pad), lambda i: (0, 0)),         # weights: constant -> VMEM-resident
            pl.BlockSpec((L, D_pad), lambda i: (0, 0)),
            pl.BlockSpec((D_pad, P), lambda i: (0, 0)),
            pl.BlockSpec((1, D_pad), lambda i: (0, 0)),
            pl.BlockSpec((1, P), lambda i: (0, 0)),
        ],
        out_specs=pl.BlockSpec((TB, P), lambda i: (i, 0)),
        compiler_params=pltpu.CompilerParams(**cp),
    )(noise, condition, kparams["w_noise"], kparams["w_cond"],
      kparams["w2"], kparams["b1"], kparams["b2"])

    return out.reshape(1, B, P)


def init_params(key, cond_dim, noise_dim, hidden_dim, output_dim):
    """Deterministic synthetic parameters (xavier-normal weights, small-uniform biases)."""
    D = hidden_dim + noise_dim
    k = jax.random.split(key, 6)

    def xavier(rng, shape):
        fan_out, fan_in = shape
        s = (2.0 / (fan_in + fan_out)) ** 0.5
        return (s * jax.random.normal(rng, shape)).astype(jnp.float32)

    def bias(rng, fan_in, n):
        bound = 1.0 / (fan_in ** 0.5)
        return jax.random.uniform(rng, (n,), minval=-bound, maxval=bound).astype(jnp.float32)

    return {
        "w_tln": xavier(k[0], (hidden_dim, cond_dim)),   # TLN transform matrix
        "b_tln": bias(k[1], cond_dim, hidden_dim),
        "w1": xavier(k[2], (D, D)),                      # nn.Linear(D, D)
        "b1": bias(k[3], D, D),
        "w2": xavier(k[4], (output_dim, D)),             # nn.Linear(D, pred)
        "b2": bias(k[5], D, output_dim),
    }


if __name__ == "__main__":
    # Small config: cfg.z_dim=8, cfg.l=16, cfg.hid_g=32, cfg.pred=4, batch=20.
    # block_rows=8 exercises multiple grid steps AND the non-divisible batch tail (OOB clipping).
    Z, L, H, P, B = 8, 16, 32, 4, 20
    mean, std = 0.5, 2.0

    key = jax.random.PRNGKey(0)
    kp, kn, kc = jax.random.split(key, 3)

    params = init_params(kp, cond_dim=L, noise_dim=Z, hidden_dim=H, output_dim=P)
    # One-time parameter preparation (folds + padding) -- NOT on the forward path.
    kparams = prepare_kernel_params(params, mean, std, noise_dim=Z)

    noise = jax.random.normal(kn, (1, B, Z), dtype=jnp.float32)
    condition = jax.random.normal(kc, (1, B, L), dtype=jnp.float32) * std + mean
    h_0 = jnp.zeros((1, B, H), dtype=jnp.float32)
    c_0 = jnp.zeros((1, B, H), dtype=jnp.float32)

    out = generator_with_tln_forward(noise, condition, h_0, c_0, kparams, block_rows=8)
    out = jax.block_until_ready(out)

    # Pure-JAX reference (original, unfolded math).
    cond_n = (condition.reshape(B, L) - mean) / std
    t = cond_n @ params["w_tln"].T + params["b_tln"]
    xcat = jnp.concatenate([noise.reshape(B, Z), t], axis=-1)
    ref = jnp.maximum(xcat @ params["w1"].T + params["b1"], 0.0) @ params["w2"].T + params["b2"]
    ref = (ref * std + mean).reshape(1, B, P)

    assert out.shape == (1, B, P)
    assert jnp.allclose(out, ref, atol=1e-4, rtol=1e-4), float(jnp.max(jnp.abs(out - ref)))

    print("KERNEL_OK")
</pallas_src>

<mosaic_0001>
module attributes {stable_mosaic.version = 11 : i64} {
  func.func @_generator_kernel(%arg0: i32, %arg1: memref<1x8x8xf32, #tpu.memory_space<vmem>>, %arg2: memref<1x8x16xf32, #tpu.memory_space<vmem>>, %arg3: memref<8x128xf32, #tpu.memory_space<vmem>>, %arg4: memref<16x128xf32, #tpu.memory_space<vmem>>, %arg5: memref<128x4xf32, #tpu.memory_space<vmem>>, %arg6: memref<1x128xf32, #tpu.memory_space<vmem>>, %arg7: memref<1x4xf32, #tpu.memory_space<vmem>>, %arg8: memref<8x4xf32, #tpu.memory_space<vmem>>) attributes {dimension_semantics = [#tpu.dimension_semantics<parallel>], iteration_bounds = array<i64: 3>, scalar_prefetch = 0 : i64, scratch_operands = 0 : i64, tpu.core_type = #tpu.core_type<tc>, window_params = [{transform_indices = @transform_0, window_bounds = array<i64: 1, 8, 8>}, {transform_indices = @transform_1, window_bounds = array<i64: 1, 8, 16>}, {pipeline_mode = #tpu.pipeline_mode<synchronous>, transform_indices = @transform_2, window_bounds = array<i64: 8, 128>}, {pipeline_mode = #tpu.pipeline_mode<synchronous>, transform_indices = @transform_3, window_bounds = array<i64: 16, 128>}, {pipeline_mode = #tpu.pipeline_mode<synchronous>, transform_indices = @transform_4, window_bounds = array<i64: 128, 4>}, {pipeline_mode = #tpu.pipeline_mode<synchronous>, transform_indices = @transform_5, window_bounds = array<i64: 1, 128>}, {pipeline_mode = #tpu.pipeline_mode<synchronous>, transform_indices = @transform_6, window_bounds = array<i64: 1, 4>}, {transform_indices = @transform_7, window_bounds = array<i64: 8, 4>}]} {
    %c0 = arith.constant 0 : index
    %c0_0 = arith.constant 0 : index
    %c0_1 = arith.constant 0 : index
    %0 = vector.load %arg1[%c0, %c0_0, %c0_1] : memref<1x8x8xf32, #tpu.memory_space<vmem>>, vector<1x8x8xf32>
    %1 = vector.shape_cast %0 : vector<1x8x8xf32> to vector<8x8xf32>
    %c0_2 = arith.constant 0 : index
    %c0_3 = arith.constant 0 : index
    %2 = vector.load %arg3[%c0_2, %c0_3] : memref<8x128xf32, #tpu.memory_space<vmem>>, vector<8x128xf32>
    %cst = arith.constant dense<0.000000e+00> : vector<8x128xf32>
    %3 = tpu.matmul %1, %2, %cst {dimension_numbers = #tpu.dot_dimension_numbers<[1], [0], [0], [1], [0, 0, 1, 1], [], []>} : vector<8x8xf32>, vector<8x128xf32>, vector<8x128xf32> -> vector<8x128xf32>
    %c0_4 = arith.constant 0 : index
    %c0_5 = arith.constant 0 : index
    %c0_6 = arith.constant 0 : index
    %4 = vector.load %arg2[%c0_4, %c0_5, %c0_6] : memref<1x8x16xf32, #tpu.memory_space<vmem>>, vector<1x8x16xf32>
    %5 = vector.shape_cast %4 : vector<1x8x16xf32> to vector<8x16xf32>
    %c0_7 = arith.constant 0 : index
    %c0_8 = arith.constant 0 : index
    %6 = vector.load %arg4[%c0_7, %c0_8] : memref<16x128xf32, #tpu.memory_space<vmem>>, vector<16x128xf32>
    %cst_9 = arith.constant dense<0.000000e+00> : vector<8x128xf32>
    %7 = tpu.matmul %5, %6, %cst_9 {dimension_numbers = #tpu.dot_dimension_numbers<[1], [0], [0], [1], [0, 0, 1, 1], [], []>} : vector<8x16xf32>, vector<16x128xf32>, vector<8x128xf32> -> vector<8x128xf32>
    %8 = arith.addf %3, %7 : vector<8x128xf32>
    %c0_10 = arith.constant 0 : index
    %c0_11 = arith.constant 0 : index
    %9 = vector.load %arg6[%c0_10, %c0_11] : memref<1x128xf32, #tpu.memory_space<vmem>>, vector<1x128xf32>
    %10 = vector.broadcast %9 : vector<1x128xf32> to vector<8x128xf32>
    %11 = arith.addf %8, %10 : vector<8x128xf32>
    %cst_12 = arith.constant 0.000000e+00 : f32
    %12 = vector.broadcast %cst_12 : f32 to vector<8x128xf32>
    %13 = arith.maximumf %11, %12 : vector<8x128xf32>
    %c0_13 = arith.constant 0 : index
    %c0_14 = arith.constant 0 : index
    %14 = vector.load %arg5[%c0_13, %c0_14] : memref<128x4xf32, #tpu.memory_space<vmem>>, vector<128x4xf32>
    %cst_15 = arith.constant dense<0.000000e+00> : vector<8x4xf32>
    %15 = tpu.matmul %13, %14, %cst_15 {dimension_numbers = #tpu.dot_dimension_numbers<[1], [0], [0], [1], [0, 0, 1, 1], [], []>} : vector<8x128xf32>, vector<128x4xf32>, vector<8x4xf32> -> vector<8x4xf32>
    %c0_16 = arith.constant 0 : index
    %c0_17 = arith.constant 0 : index
    %16 = vector.load %arg7[%c0_16, %c0_17] : memref<1x4xf32, #tpu.memory_space<vmem>>, vector<1x4xf32>
    %17 = vector.broadcast %16 : vector<1x4xf32> to vector<8x4xf32>
    %18 = arith.addf %15, %17 : vector<8x4xf32>
    %c0_18 = arith.constant 0 : index
    %c0_19 = arith.constant 0 : index
    %19 = vector.load %arg8[%c0_18, %c0_19] : memref<8x4xf32, #tpu.memory_space<vmem>>, vector<8x4xf32>
    tpu.vector_store %arg8[%c0_18, %c0_19], %18 {strides = array<i32>} : memref<8x4xf32, #tpu.memory_space<vmem>>, vector<8x4xf32>,
    return
  }
  func.func @transform_0(%arg0: i32) -> (i32, i32, i32) {
    %c0_i32 = arith.constant 0 : i32
    %c0_i32_0 = arith.constant 0 : i32
    %c0_i32_1 = arith.constant 0 : i32
    return %c0_i32, %arg0, %c0_i32_0 : i32, i32, i32
  }
  func.func @transform_1(%arg0: i32) -> (i32, i32, i32) {
    %c0_i32 = arith.constant 0 : i32
    %c0_i32_0 = arith.constant 0 : i32
    %c0_i32_1 = arith.constant 0 : i32
    return %c0_i32, %arg0, %c0_i32_0 : i32, i32, i32
  }
  func.func @transform_2(%arg0: i32) -> (i32, i32) {
    %c0_i32 = arith.constant 0 : i32
    %c0_i32_0 = arith.constant 0 : i32
    %c0_i32_1 = arith.constant 0 : i32
    return %c0_i32, %c0_i32_0 : i32, i32
  }
  func.func @transform_3(%arg0: i32) -> (i32, i32) {
    %c0_i32 = arith.constant 0 : i32
    %c0_i32_0 = arith.constant 0 : i32
    %c0_i32_1 = arith.constant 0 : i32
    return %c0_i32, %c0_i32_0 : i32, i32
  }
  func.func @transform_4(%arg0: i32) -> (i32, i32) {
    %c0_i32 = arith.constant 0 : i32
    %c0_i32_0 = arith.constant 0 : i32
    %c0_i32_1 = arith.constant 0 : i32
    return %c0_i32, %c0_i32_0 : i32, i32
  }
  func.func @transform_5(%arg0: i32) -> (i32, i32) {
    %c0_i32 = arith.constant 0 : i32
    %c0_i32_0 = arith.constant 0 : i32
    %c0_i32_1 = arith.constant 0 : i32
    return %c0_i32, %c0_i32_0 : i32, i32
  }
  func.func @transform_6(%arg0: i32) -> (i32, i32) {
    %c0_i32 = arith.constant 0 : i32
    %c0_i32_0 = arith.constant 0 : i32
    %c0_i32_1 = arith.constant 0 : i32
    return %c0_i32, %c0_i32_0 : i32, i32
  }
  func.func @transform_7(%arg0: i32) -> (i32, i32) {
    %c0_i32 = arith.constant 0 : i32
    %c0_i32_0 = arith.constant 0 : i32
    return %arg0, %c0_i32 : i32, i32
  }
}

</mosaic_0001>

<bundles_post_ra>
// kernel: tpu_custom_call.1
= control target key start
LH: loop header
LB: loop body
LE: loop exit
PB: predicated region body
PF: predicated region fallthrough
CT: control target
= control target key end

     0   :  { %s527_s24 = smov 0   ;;  %s615_s0 = inlined_call_operand.vmem [shape: f32[1,20,8], index: 0, kind: input, shape index: {}]   ;;  %s616_s1 = inlined_call_operand.vmem [shape: f32[1,20,16], index: 1, kind: input, shape index: {}]   ;;  %s617_s2 = inlined_call_operand.vmem [shape: f32[8,128], index: 2, kind: input, shape index: {}]   ;;  %s618_s3 = inlined_call_operand.vmem [shape: f32[16,128], index: 3, kind: input, shape index: {}]   ;;  %s619_s4 = inlined_call_operand.vmem [shape: f32[128,4], index: 4, kind: input, shape index: {}]   ;;  %s620_s5 = inlined_call_operand.vmem [shape: f32[1,128], index: 5, kind: input, shape index: {}]   ;;  %s621_s6 = inlined_call_operand.vmem [shape: f32[1,4], index: 6, kind: input, shape index: {}]   ;;  %s622_s7 = inlined_call_operand.vmem [shape: f32[20,4], index: 7, kind: output, shape index: {}]  }
   0x1 LB: > { %s457_s25 = sadd.s32 4294967295, %s485_s24   ;;  %p461_p0 = scmp.ge.s32.totalorder %s485_s24, 1  ;;  %s485_s24 = sphi %s527_s24, %s17_s24  }
   0x2   : > { %p245_p1 = scmp.lt.s32.totalorder %s485_s24, 4 }
   0x4   : > { %p246_p2 = pnand %p461_p0, %p245_p1 }
   0x5   : > { %p279_p3 = scmp.lt.s32.totalorder (!%p246_p2), %s457_s25, 2 }
   0x6   : > { %249 = sbr.rel (%p246_p2) target bundleno = 283 (0x11b), region = 48 }
   0xb   : > { %v295_v0 = vld [vmem:[%s618_s3 + $0x8] sm:$0xff]  ;;  %v294_v1 = vld [vmem:[%s618_s3] sm:$0xff]  ;;  %v365_v3 = vld [vmem:[%s619_s4 + $0x78] sm:$0xff]  ;;  %s624_s25 = smov (!%p279_p3, %s457_s25), 2  ;;  %vm296_vm0 = vcmask 130048   ;;  %vm320_vm1 = vcmask 64512  }
   0xc   : > { %v292_v2 = vld [vmem:[%s617_s2] sm:$0xff]  ;;  %314 = vmatpush.msra.mxu0 %v295_v0  ;;  %v364_v4 = vld [vmem:[%s619_s4 + $0x70] sm:$0xff]  ;;  %370 = vmatpush.msra.mxu2 %v365_v3  ;;  %v363_v5 = vld [vmem:[%s619_s4 + $0x68] sm:$0xff]  ;;  %s553_s15 = sshll.u32 %s624_s25, 3  ;;  %vm390_vm2 = vcmask 31744  }
   0xd   : > { %339 = vmatpush.msra.mxu1 %v292_v2  ;;  %s286_s18 = scalar_lea.vmem %s616_s1, %s553_s15  ;;  %v362_v6 = vld [vmem:[%s619_s4 + $0x60] sm:$0xff]  ;;  %s282_s23 = scalar_lea.vmem %s615_s0, %s553_s15  ;;  %v361_v9 = vld [vmem:[%s619_s4 + $0x58] sm:$0xff]  ;;  %v360_v10 = vld [vmem:[%s619_s4 + $0x50] sm:$0xff] }
   0xe   : > { %315 = vmatpush.msra.mxu0 %v294_v1  ;;  %371 = vmatpush.msra.mxu2 %v364_v4  ;;  %v293_v7 = vld [vmem:[%s286_s18] sm:$0xff]  ;;  %v359_v11 = vld [vmem:[%s619_s4 + $0x48] sm:$0xff]  ;;  %v357_v13 = vld [vmem:[%s619_s4 + $0x38] sm:$0xff]  ;;  %s290_s11 = scalar_lea.vmem %s622_s7, %s553_s15 }
   0xf   : > { %465 = vmatmul.msk.f32.vlgmr.msra.gmra.mxu0 %vm296_vm0, %v293_v7  ;;  %v291_v8 = vld [vmem:[%s282_s23] sm:$0xff]  ;;  %v356_v14 = vld [vmem:[%s619_s4 + $0x30] sm:$0xff]  ;;  %v355_v15 = vld [vmem:[%s619_s4 + $0x28] sm:$0xff] }
  0x10   : > { %372 = vmatpush.msra.mxu2 %v363_v5  ;;  %466 = vmatmul.msk.f32.vlgmr.msra.gmra.mxu1 %vm320_vm1, %v291_v8  ;;  %v358_v12 = vld [vmem:[%s619_s4 + $0x40] sm:$0xff]  ;;  %v353_v17 = vld [vmem:[%s619_s4 + $0x18] sm:$0xff]  ;;  %v352_v18 = vld [vmem:[%s619_s4 + $0x10] sm:$0xff] }
  0x11   : > { %v354_v16 = vld [vmem:[%s619_s4 + $0x20] sm:$0xff]  ;;  %v351_v19 = vld [vmem:[%s619_s4 + $0x8] sm:$0xff] }
  0x12   : > { %373 = vmatpush.msra.mxu2 %v362_v6  ;;  %v350_v20 = vld [vmem:[%s619_s4] sm:$0xff] }
  0x13   : > { %v477_v22 = vld [vmem:[%s620_s5] ss:$0 sm:$0xff] }
  0x14   : > { %374 = vmatpush.msra.mxu2 %v361_v9  ;;  %v478_v27 = vld [vmem:[%s621_s6] ss:$0 sm:$0xff] }
  0x16   : > { %375 = vmatpush.msra.mxu2 %v360_v10 }
  0x18   : > { %376 = vmatpush.msra.mxu2 %v359_v11 }
  0x1a   : > { %377 = vmatpush.msra.mxu2 %v358_v12 }
  0x1c   : > { %378 = vmatpush.msra.mxu2 %v357_v13 }
  0x1e   : > { %379 = vmatpush.msra.mxu2 %v356_v14 }
  0x20   : > { %380 = vmatpush.msra.mxu2 %v355_v15 }
  0x22   : > { %381 = vmatpush.msra.mxu2 %v354_v16 }
  0x24   : > { %382 = vmatpush.msra.mxu2 %v353_v17 }
  0x26   : > { %383 = vmatpush.msra.mxu2 %v352_v18 }
  0x28   : > { %384 = vmatpush.msra.mxu2 %v351_v19 }
  0x2a   : > { %385 = vmatpush.msra.mxu2 %v350_v20 }
  0x8c   : > { %v317_v21 = vpop.f32.mrf.mxu0 }
  0x8d   : > { %v341_v23 = vpop.f32.mrf.mxu1 }
  0x8e   : > { %v342_v24 = vadd.f32 %v341_v23, %v317_v21 }
  0x90   : > { %v348_v25 = vadd.f32 %v477_v22, %v342_v24 }
  0x92   : > { %v349_v26 = vmax.f32 %v348_v25, 0.0 }
  0x94   : > { %386 = vmatmul.f32.vlgmr.msra.gmra.mxu2 %v349_v26 }
 0x117   : > { %v387_v28 = vpop.f32.mrf.mxu2 }
 0x118   : > { %v388_v29 = vadd.f32 %v478_v27, %v387_v28 }
 0x11a   : > { %391 = vst.msk [vmem:[%s290_s11] sm:$0xff] %vm390_vm2, %v388_v29 }
 0x11b PF: > { %s17_s24 = sadd.s32 1, %s485_s24  }
 0x11c   : > { %p14_p4 = scmp.ge.s32.totalorder %s17_s24, 5  }
 0x11e   :  { %16 = sbr.rel (!%p14_p4) target bundleno = 1 (0x1), region = 81 }

</bundles_post_ra>
